<compile_context>
chip_gen: v6e
topology: v6e:2x2x1
jax: 0.10.0
libtpu: 0.0.40
codegen_flags: <defaults>
</compile_context>

<pallas_src>
import functools

import jax
import jax.numpy as jnp
from jax.experimental import pallas as pl
from jax.experimental.pallas import tpu as pltpu


def _cdiv(a, b):
    return -(-a // b)


def _round_up(n, m):
    return _cdiv(n, m) * m


def encoder_kernel(x_ref, w_ref, b_ref, o_ref):
    # MXU matmul with f32 accumulate; bias add + tanh in f32 (EUP tanh).
    acc = jnp.dot(x_ref[...], w_ref[...], preferred_element_type=jnp.float32)
    o_ref[...] = jnp.tanh(acc + b_ref[...]).astype(o_ref.dtype)


@functools.partial(jax.jit, static_argnames=("block_rows",))
def encoder_forward(x, w, b, *, block_rows=4096):
    """tanh(x @ w + b).

    x: (B, rnn_size) f32  -- B may be batch or batch*time; stack timesteps
                             into one call to amortize launch/DMA overhead.
    w: (rnn_size, hidden) f32  (pre-transposed vs. PyTorch's (hidden, rnn))
    b: (hidden,) f32
    """
    B, R = x.shape
    R2, H = w.shape
    assert R == R2, "weight shape mismatch"

    if B >= 8:
        # Pick the row tile to minimize grid steps and padding, keep it a
        # multiple of 8 sublanes, and keep >=2 tiles when possible so v7x can
        # shard the "parallel" axis across both TensorCores.
        n_tiles = max(1, _cdiv(B, block_rows))
        tb = _round_up(_cdiv(B, n_tiles), 8)
        if B >= 16:
            tb = min(tb, _round_up(_cdiv(B, 2), 8))
        tb = min(tb, (B // 8) * 8)  # block rows must fit inside the array
        x_in = x
        b_rows = B
    else:
        # Tiny batches: pad rows up to one 8-sublane tile (only path that pads).
        tb = 8
        x_in = jnp.pad(x, ((0, 8 - B), (0, 0)))
        b_rows = 8

    grid_m = _cdiv(b_rows, tb)
    bias2d = b.reshape(1, H)

    itemsize = 4  # f32 everywhere
    cost = pl.CostEstimate(
        flops=2 * B * R * H,
        transcendentals=B * H,
        bytes_accessed=(B * R + R * H + H + B * H) * itemsize,
    )

    out = pl.pallas_call(
        encoder_kernel,
        out_shape=jax.ShapeDtypeStruct((b_rows, H), x.dtype),
        grid_spec=pl.GridSpec(
            grid=(grid_m,),
            in_specs=[
                # x tiles stream along the row axis (double-buffered by Pallas);
                # last dim == full extent, so no K padding is needed.
                pl.BlockSpec((tb, R), lambda i: (i, 0)),
                # W and bias are VMEM-resident across all row tiles.
                pl.BlockSpec((R, H), lambda i: (0, 0)),
                pl.BlockSpec((1, H), lambda i: (0, 0)),
            ],
            # Exact (tb, H) output tile: masked stores for H<128, but no 4x
            # write amplification and no wrapper slice pass afterwards.
            out_specs=pl.BlockSpec((tb, H), lambda i: (i, 0)),
        ),
        compiler_params=pltpu.CompilerParams(
            # Independent row tiles -> shard across both TCs on v7x.
            dimension_semantics=("parallel",),
        ),
        cost_estimate=cost,
    )(x_in, w, bias2d)

    if b_rows != B:
        out = out[:B]
    return out


def init_encoder_params(key, rnn_size, hidden_size):
    """Deterministic init matching nn.Linear + xavier_normal on the weight."""
    kw, kb = jax.random.split(key)
    # xavier_normal: std = gain * sqrt(2 / (fan_in + fan_out)), gain = 1
    std = (2.0 / (rnn_size + hidden_size)) ** 0.5
    # PyTorch weight is (hidden, rnn); store transposed for x @ W.
    w_t = jax.random.normal(kw, (hidden_size, rnn_size), jnp.float32) * std
    w = w_t.T
    # nn.Linear default bias init: U(-1/sqrt(fan_in), 1/sqrt(fan_in))
    bound = 1.0 / (rnn_size ** 0.5)
    b = jax.random.uniform(kb, (hidden_size,), jnp.float32, -bound, bound)
    return w, b


if __name__ == "__main__":
    key = jax.random.PRNGKey(0)
    k_x, k_p, k_x2 = jax.random.split(key, 3)

    batch, rnn_size, hidden_size = 8, 32, 32
    x = jax.random.normal(k_x, (batch, rnn_size), jnp.float32)
    w, b = init_encoder_params(k_p, rnn_size, hidden_size)

    # Small single-tile case (matches the original module's shapes).
    out = encoder_forward(x, w, b)
    jax.block_until_ready(out)
    assert out.shape == (batch, hidden_size)
    assert out.dtype == jnp.float32

    ref = jnp.tanh(x @ w + b)
    assert bool(jnp.all(jnp.isfinite(out)))
    assert jnp.allclose(out, ref, atol=2e-2, rtol=2e-2)

    # Stacked (B*T)-row case with a ragged row count: exercises the tiled,
    # double-buffered grid path and the masked last block.
    big_rows = 1000
    x_big = jax.random.normal(k_x2, (big_rows, rnn_size), jnp.float32)
    out_big = encoder_forward(x_big, w, b)
    jax.block_until_ready(out_big)
    assert out_big.shape == (big_rows, hidden_size)
    ref_big = jnp.tanh(x_big @ w + b)
    assert bool(jnp.all(jnp.isfinite(out_big)))
    assert jnp.allclose(out_big, ref_big, atol=2e-2, rtol=2e-2)

    print("KERNEL_OK")
</pallas_src>

<mosaic_0001>
module attributes {stable_mosaic.version = 11 : i64} {
  func.func @encoder_kernel(%arg0: i32, %arg1: memref<8x32xf32, #tpu.memory_space<vmem>>, %arg2: memref<32x32xf32, #tpu.memory_space<vmem>>, %arg3: memref<1x32xf32, #tpu.memory_space<vmem>>, %arg4: memref<8x32xf32, #tpu.memory_space<vmem>>) attributes {dimension_semantics = [#tpu.dimension_semantics<parallel>], iteration_bounds = array<i64: 1>, scalar_prefetch = 0 : i64, scratch_operands = 0 : i64, tpu.core_type = #tpu.core_type<tc>, window_params = [{transform_indices = @transform_0, window_bounds = array<i64: 8, 32>}, {pipeline_mode = #tpu.pipeline_mode<synchronous>, transform_indices = @transform_1, window_bounds = array<i64: 32, 32>}, {pipeline_mode = #tpu.pipeline_mode<synchronous>, transform_indices = @transform_2, window_bounds = array<i64: 1, 32>}, {transform_indices = @transform_3, window_bounds = array<i64: 8, 32>}]} {
    %c0 = arith.constant 0 : index
    %c0_0 = arith.constant 0 : index
    %0 = vector.load %arg1[%c0, %c0_0] : memref<8x32xf32, #tpu.memory_space<vmem>>, vector<8x32xf32>
    %c0_1 = arith.constant 0 : index
    %c0_2 = arith.constant 0 : index
    %1 = vector.load %arg2[%c0_1, %c0_2] : memref<32x32xf32, #tpu.memory_space<vmem>>, vector<32x32xf32>
    %cst = arith.constant dense<0.000000e+00> : vector<8x32xf32>
    %2 = tpu.matmul %0, %1, %cst {dimension_numbers = #tpu.dot_dimension_numbers<[1], [0], [0], [1], [0, 0, 1, 1], [], []>} : vector<8x32xf32>, vector<32x32xf32>, vector<8x32xf32> -> vector<8x32xf32>
    %c0_3 = arith.constant 0 : index
    %c0_4 = arith.constant 0 : index
    %3 = vector.load %arg3[%c0_3, %c0_4] : memref<1x32xf32, #tpu.memory_space<vmem>>, vector<1x32xf32>
    %4 = vector.broadcast %3 : vector<1x32xf32> to vector<8x32xf32>
    %5 = arith.addf %2, %4 : vector<8x32xf32>
    %6 = math.tanh %5 : vector<8x32xf32>
    %c0_5 = arith.constant 0 : index
    %c0_6 = arith.constant 0 : index
    %7 = vector.load %arg4[%c0_5, %c0_6] : memref<8x32xf32, #tpu.memory_space<vmem>>, vector<8x32xf32>
    tpu.vector_store %arg4[%c0_5, %c0_6], %6 {strides = array<i32>} : memref<8x32xf32, #tpu.memory_space<vmem>>, vector<8x32xf32>,
    return
  }
  func.func @transform_0(%arg0: i32) -> (i32, i32) {
    %c0_i32 = arith.constant 0 : i32
    %c0_i32_0 = arith.constant 0 : i32
    return %arg0, %c0_i32 : i32, i32
  }
  func.func @transform_1(%arg0: i32) -> (i32, i32) {
    %c0_i32 = arith.constant 0 : i32
    %c0_i32_0 = arith.constant 0 : i32
    %c0_i32_1 = arith.constant 0 : i32
    return %c0_i32, %c0_i32_0 : i32, i32
  }
  func.func @transform_2(%arg0: i32) -> (i32, i32) {
    %c0_i32 = arith.constant 0 : i32
    %c0_i32_0 = arith.constant 0 : i32
    %c0_i32_1 = arith.constant 0 : i32
    return %c0_i32, %c0_i32_0 : i32, i32
  }
  func.func @transform_3(%arg0: i32) -> (i32, i32) {
    %c0_i32 = arith.constant 0 : i32
    %c0_i32_0 = arith.constant 0 : i32
    return %arg0, %c0_i32 : i32, i32
  }
}

</mosaic_0001>

<bundles_post_ra>
// kernel: encoder_forward.1
= control target key start
LH: loop header
LB: loop body
LE: loop exit
PB: predicated region body
PF: predicated region fallthrough
CT: control target
= control target key end

     0   :  { %8 = vsyncpa [#allocation3], 0  ;;  %s277_s0 = inlined_call_operand.hbm [shape: f32[8,32], index: 0, kind: input, shape index: {}]   ;;  %s278_s1 = inlined_call_operand.hbm [shape: f32[32,32], index: 1, kind: input, shape index: {}]   ;;  %s279_s2 = inlined_call_operand.vmem [shape: f32[1,32], index: 2, kind: input, shape index: {}]   ;;  %s280_s3 = inlined_call_operand.hbm [shape: f32[8,32], index: 3, kind: output, shape index: {}]  }
   0x1   :  { %9 = vsyncpa [#allocation6], 0 }
   0x2   :  { %10 = vsyncpa [#allocation4], 0  ;;  %s238_s12 = smov [#allocation2]   ;;  %s239_s14 = smov [#allocation5]  }
   0x3   :  { %s17_s13 = sshll.u32 %s238_s12, 4  ;;  %s26_s15 = sshll.u32 %s239_s14, 4  ;;  %s18_s13 = int_to_ptr.vmem [resolvable:$true] %s17_s13  ;;  %s27_s15 = int_to_ptr.vmem [resolvable:$true] %s26_s15 }
   0x4   :  { %s180_s16 = scalar_lea.vmem %s18_s13, 128  ;;  %p185_p1 = scmp.lt.s32.totalorder %s18_s13, %s18_s13 }
   0x5   :  { %p181_p0 = scmp.ne.s32.totalorder %s18_s13, %s180_s16  ;;  %p186_p2 = scmp.lt.s32.totalorder %s180_s16, %s180_s16 }
   0x7   :  { %p187_p3 = por %p186_p2, %p185_p1 }
   0x9   :  { %p188_p4 = pnand %p187_p3, %p181_p0 }
   0xb   :  { %191 = shalt.err (!%p188_p4)
}
   0xc   :  { %20 = dma.hbm_to_vmem [thread:$0]  %s277_s0, 128, %s18_s13, [#allocation3]  }
   0xd   :  { %s200_s19 = scalar_lea.vmem %s27_s15, 512  ;;  %p205_p6 = scmp.lt.s32.totalorder %s27_s15, %s27_s15 }
   0xe   :  { %p201_p5 = scmp.ne.s32.totalorder %s27_s15, %s200_s19  ;;  %p206_p7 = scmp.lt.s32.totalorder %s200_s19, %s200_s19 }
  0x10   :  { %p207_p8 = por %p206_p7, %p205_p6 }
  0x12   :  { %p208_p9 = pnand %p207_p8, %p201_p5 }
  0x14   :  { %211 = shalt.err (!%p208_p9)
}
  0x15   :  { %s240_s20 = smov 128   ;;  %s241_s21 = smov 8  }
  0x16   :  { %32 = dma.hbm_to_vmem [thread:$0]  %s278_s1, 512, %s27_s15, [#allocation6], %s240_s20, %s240_s20, %s241_s21  }
  0x17   :  { %232 = dma.done.wait [#allocation3], 128  }
  0x18   :  { %233 = vsyncadd [#allocation3], 4294967168 }
  0x19   :  { %234 = dma.done.wait [#allocation6], 512  }
  0x1a   :  { %235 = vsyncadd [#allocation6], 4294966784  ;;  %v242_v0 = vmov 0.0   ;;  %vm243_vm0 = vmmov 0   ;;  %v45_v1 = vld [vmem:[#allocation5 + $0x18] sm:$0xff]  ;;  %v44_v2 = vld [vmem:[#allocation5 + $0x10] sm:$0xff] }
  0x1b   :  { %152 = vmatprep.subr.mxu0 %v242_v0  ;;  %160 = vmatprep.mubr.msk.f32.mxu0 %vm243_vm0, %v242_v0  ;;  %v43_v3 = vld [vmem:[#allocation5 + $0x8] sm:$0xff]  ;;  %v42_v4 = vld [vmem:[#allocation5] sm:$0xff]  ;;  %v41_v5 = vld [vmem:[#allocation2] sm:$0xff]  ;;  %vm53_vm1 = vcmask 261120   ;;  %s244_s24 = smov [#allocation7]  }
  0x1c   :  { %153 = vmatpush3.msra.mxu0 %v45_v1  ;;  %v145_v6 = vld [vmem:[%s279_s2] ss:$0 sm:$0xff]  ;;  %s135_s25 = sshll.u32 %s244_s24, 4  ;;  %s136_s25 = int_to_ptr.vmem [resolvable:$true] %s135_s25 }
  0x1d   :  { %154 = vmatprep.subr.mxu0 %v242_v0  ;;  %s212_s26 = scalar_lea.vmem %s136_s25, 128  ;;  %p217_p11 = scmp.lt.s32.totalorder %s136_s25, %s136_s25 }
  0x1e   :  { %155 = vmatpush3.msra.mxu0 %v44_v2  ;;  %p213_p10 = scmp.ne.s32.totalorder %s136_s25, %s212_s26  ;;  %p218_p12 = scmp.lt.s32.totalorder %s212_s26, %s212_s26 }
  0x1f   :  { %156 = vmatprep.subr.mxu0 %v242_v0 }
  0x20   :  { %157 = vmatpush3.msra.mxu0 %v43_v3  ;;  %p219_p13 = por %p218_p12, %p217_p11 }
  0x21   :  { %158 = vmatprep.subr.mxu0 %v242_v0 }
  0x22   :  { %159 = vmatpush3.msra.mxu0 %v42_v4  ;;  %p220_p0 = pnand %p219_p13, %p213_p10 }
  0x23   :  { %161 = vmatmul.mubr.msk.f32.vlgmr.msra.gmra.mxu0 %vm53_vm1, %v41_v5 }
  0xe3   :  { %v123_v7 = vpop.f32.mrf.mxu0 }
  0xe4   :  { %v124_v8 = vadd.f32 %v145_v6, %v123_v7 }
  0xe5   :  { %v162_v9 = vpop.f32.mrf.mxu0 }
  0xe6   :  { %170 = vtanh.f32 %v124_v8 }
  0xf3   :  { %v171_v10 = vpop.eup %170 }
  0xf4   :  { %128 = vst.msk [vmem:[#allocation7] sm:$0xff] %vm53_vm1, %v171_v10 }
  0xf5   :  { %223 = shalt.err (!%p220_p0)
}
  0xf6   :  { %138 = dma.vmem_to_hbm [thread:$0]  %s136_s25, 128, %s280_s3, [#allocation4]  }
  0xf7   :  { %236 = dma.done.wait [#allocation4], 128  }
  0xf8   :  { %237 = vsyncadd [#allocation4], 4294967168 }
  0xf9   :  { %142 = vsyncpa [#allocation3], 1 }
  0xfa   :  { %143 = vsyncpa [#allocation6], 1 }
  0xfb   :  { %144 = vsyncpa [#allocation4], 1 }

</bundles_post_ra>
